<compile_context>
chip_gen: v7x
topology: tpu7x:2x2x1
jax: 0.10.0
libtpu: 0.0.40
codegen_flags: <defaults>
</compile_context>

<pallas_src>
import jax
import jax.numpy as jnp
from jax.experimental import pallas as pl
from jax.experimental.pallas import tpu as pltpu


def _round_up(x: int, m: int) -> int:
    return (x + m - 1) // m * m


def _weight_norm(v, g):
    """PyTorch nn.utils.weight_norm on nn.Linear (dim=0): W = g * v / ||v||_row.

    v: (out, in), g: (out,). Returns effective weight (out, in)."""
    norm = jnp.sqrt(jnp.sum(v * v, axis=1, keepdims=True))
    return (g[:, None] / norm) * v


def _edge_weight_cgs_kernel(node_ref, hc_ref, w1_ref, w2_ref, b2_ref, out_ref, h2m_ref):
    """One batch tile: joint MLP on cat(node, cond) + lane-dense gram (edge logits)."""
    tb, np_n, dn_p = node_ref.shape          # node tile (bf16), np_n % 16 == 0, dn_p % 128 == 0
    de_p = w1_ref.shape[1]                   # padded edge_dim, % 128 == 0
    np_m = out_ref.shape[2]                  # lane-dense gram columns, % 128 == 0

    # ---- Linear1 node half (bf16 MXU, f32 acc); cond half + b1 arrive pre-folded as hc ----
    h1 = jnp.dot(node_ref[...].reshape(tb * np_n, dn_p), w1_ref[...],
                 preferred_element_type=jnp.float32).reshape(tb, np_n, de_p)
    h1 = jnp.maximum(h1 + hc_ref[...], 0.0).astype(jnp.bfloat16)     # hc: (TB, 1, De_p) f32

    # ---- Linear2 + ReLU ----
    h2 = jnp.dot(h1.reshape(tb * np_n, de_p), w2_ref[...],
                 preferred_element_type=jnp.float32).reshape(tb, np_n, de_p)
    h2 = jnp.maximum(h2 + b2_ref[...], 0.0).astype(jnp.bfloat16)

    # ---- lane-dense gram RHS: h2 zero-padded along the node axis up to np_m ----
    if np_m > np_n:                                            # static
        h2m_ref[:, np_n:, :] = jnp.zeros((tb, np_m - np_n, de_p), jnp.bfloat16)
    h2m_ref[:, :np_n, :] = h2

    # edge logits = joint_f @ joint_f^T per batch element (batched MXU matmul; contraction on
    # the minor dim of both operands -> transposed-weight load, no per-batch XLU transpose).
    logits = jax.lax.dot_general(
        h2, h2m_ref[...],
        dimension_numbers=(((2,), (2,)), ((0,), (0,))),
        preferred_element_type=jnp.float32)                    # (TB, np_n, np_m)
    out_ref[...] = logits.astype(out_ref.dtype)


def edge_weight_cgs_forward(node_feats, cond_feats, params):
    """node_feats: (B, N, node_dim), cond_feats: (B, cond_dim).

    Returns edge logits flattened to (B*N*N, 1), matching torch's .view(-1, 1)."""
    B, N, Dn = node_feats.shape
    Dc = cond_feats.shape[1]
    De = params["v1"].shape[0]

    # ---- cold-path param glue: fold weight-norm, split W1, lane-pad dims, cast to bf16 ----
    De_p = _round_up(De, 128)      # hidden / edge dim, lane-dense
    Dn_p = _round_up(Dn, 128)      # contraction dim of linear1, lane-dense
    NP_n = _round_up(N, 16)        # node rows (bf16 sublane packing)
    NP_m = _round_up(N, 128)       # gram columns (lane-dense output stores)

    w1 = _weight_norm(params["v1"], params["g1"]).T            # (Dn+Dc, De) f32
    w1n = jnp.zeros((Dn_p, De_p), jnp.float32).at[:Dn, :De].set(w1[:Dn]).astype(jnp.bfloat16)
    w2 = _weight_norm(params["v2"], params["g2"]).T            # (De, De) f32
    w2p = jnp.zeros((De_p, De_p), jnp.float32).at[:De, :De].set(w2).astype(jnp.bfloat16)
    b2 = jnp.zeros((1, De_p), jnp.float32).at[:, :De].set(params["b2"].reshape(1, De))

    # cond contribution of linear1 with b1 folded in — a tiny (B, Dc)x(Dc, De) matmul done once
    # here in f32 (removes cond/W1c/b1 from the hot loop and the (TB, Np, De) bias add).
    hc = cond_feats.astype(jnp.float32) @ w1[Dn:] + params["b1"].reshape(1, De)   # (B, De)
    hc = jnp.pad(hc, ((0, 0), (0, De_p - De)))                                    # (B, De_p)

    # ---- activations: pad node/feature axes, cast to bf16 (halves node-feat DMA bytes) ----
    nodes = jnp.pad(node_feats, ((0, 0), (0, NP_n - N), (0, Dn_p - Dn))).astype(jnp.bfloat16)

    # ---- batch tile sizing against a per-generation VMEM budget ----
    try:
        phys = int(getattr(pltpu.get_tpu_info(), "vmem_capacity_bytes", 0)) or 128 * 1024 * 1024
    except Exception:
        phys = 128 * 1024 * 1024
    # 128 MiB parts (v5e/v6e) -> 96 MiB; v7x 64 MiB part -> 48 MiB (internal-scratch headroom).
    vmem_limit = int(min(96 * 1024 * 1024, (phys * 3) // 4))

    weight_bytes = 2 * (Dn_p * De_p + De_p * De_p) + 4 * De_p          # single-buffered weights
    per_b = (2 * 2 * NP_n * Dn_p          # node block (bf16, double-buffered)
             + 2 * 4 * De_p               # hc block (f32, double-buffered)
             + 2 * 4 * NP_n * NP_m        # out block (f32, double-buffered)
             + 2 * NP_m * De_p            # h2m scratch (bf16)
             + 12 * NP_n * De_p           # h1/h2 f32 + bf16 temporaries
             + 4 * NP_n * NP_m)           # logits temporary (f32)
    budget = int(vmem_limit * 0.7) - weight_bytes
    tb_vmem = max(1, budget // max(per_b, 1))
    tb_rows = max(1, 4096 // NP_n)                 # target ~4096 MXU rows per grid step
    TB = int(max(1, min(B, tb_vmem, tb_rows)))
    TB = int(min(TB, max(1, pl.cdiv(B, 2))))       # >=2 grid steps so v7x's 2 TCs both work

    Bp = _round_up(B, TB)
    if Bp != B:
        nodes = jnp.pad(nodes, ((0, Bp - B), (0, 0), (0, 0)))
        hc = jnp.pad(hc, ((0, Bp - B), (0, 0)))
    hc = hc[:, None, :]                            # (Bp, 1, De_p): last-two dims (1, De_p)

    flops = 2 * Bp * NP_n * De_p * (Dn_p + De_p + NP_m)
    bytes_accessed = (2 * Bp * NP_n * Dn_p + 4 * Bp * De_p
                      + 2 * (Dn_p * De_p + De_p * De_p) + 4 * De_p
                      + 4 * Bp * NP_n * NP_m)

    out = pl.pallas_call(
        _edge_weight_cgs_kernel,
        out_shape=jax.ShapeDtypeStruct((Bp, NP_n, NP_m), jnp.float32),
        grid=(Bp // TB,),
        in_specs=[
            pl.BlockSpec((TB, NP_n, Dn_p), lambda b: (b, 0, 0)),           # node feats (bf16)
            pl.BlockSpec((TB, 1, De_p),    lambda b: (b, 0, 0)),           # cond@W1c + b1 (f32)
            pl.BlockSpec((Dn_p, De_p), lambda b: (0, 0),
                         pipeline_mode=pl.Buffered(1)),                    # W1 node half (resident)
            pl.BlockSpec((De_p, De_p), lambda b: (0, 0),
                         pipeline_mode=pl.Buffered(1)),                    # W2 (resident)
            pl.BlockSpec((1, De_p),    lambda b: (0, 0),
                         pipeline_mode=pl.Buffered(1)),                    # b2
        ],
        out_specs=pl.BlockSpec((TB, NP_n, NP_m), lambda b: (b, 0, 0)),
        scratch_shapes=[pltpu.VMEM((TB, NP_m, De_p), jnp.bfloat16)],       # lane-padded gram RHS
        compiler_params=pltpu.CompilerParams(
            dimension_semantics=("parallel",),
            vmem_limit_bytes=vmem_limit),
        cost_estimate=pl.CostEstimate(flops=flops, transcendentals=0,
                                      bytes_accessed=bytes_accessed),
    )(nodes, hc, w1n, w2p, b2)

    # Padded rows/columns are mathematically inert only because they are sliced off here; keep
    # this slice if padding changes. (Downstream could also take (B, N, N) directly and flatten.)
    edge_logits = out[:B, :N, :N]
    return edge_logits.reshape(-1, 1)


def edge_weight_cgs_reference(node_feats, cond_feats, params):
    """Pure-JAX f32 reference for correctness checking."""
    B, N, _ = node_feats.shape
    w1 = _weight_norm(params["v1"], params["g1"])            # (De, Dn+Dc)
    w2 = _weight_norm(params["v2"], params["g2"])            # (De, De)
    cond_exp = jnp.broadcast_to(cond_feats[:, None, :], (B, N, cond_feats.shape[1]))
    x = jnp.concatenate([node_feats, cond_exp], axis=-1)
    h = jax.nn.relu(x @ w1.T + params["b1"])
    h = jax.nn.relu(h @ w2.T + params["b2"])
    logits = jnp.einsum('bnd,bmd->bnm', h, h)
    return logits.reshape(-1, 1)


def make_params(key, node_dim, cond_dim, edge_dim):
    ks = jax.random.split(key, 6)
    s = 0.1
    return {
        # weight_norm(Linear(node_dim + cond_dim -> edge_dim))
        "v1": s * jax.random.normal(ks[0], (edge_dim, node_dim + cond_dim), jnp.float32),
        "g1": 1.0 + 0.05 * jax.random.normal(ks[1], (edge_dim,), jnp.float32),
        "b1": s * jax.random.normal(ks[2], (edge_dim,), jnp.float32),
        # weight_norm(Linear(edge_dim -> edge_dim))
        "v2": s * jax.random.normal(ks[3], (edge_dim, edge_dim), jnp.float32),
        "g2": 1.0 + 0.05 * jax.random.normal(ks[4], (edge_dim,), jnp.float32),
        "b2": s * jax.random.normal(ks[5], (edge_dim,), jnp.float32),
    }


if __name__ == "__main__":
    B, N = 2, 8                       # batch, nodes per graph
    node_dim, cond_dim, edge_dim = 32, 32, 32

    key = jax.random.PRNGKey(0)
    k_node, k_cond, k_params = jax.random.split(key, 3)

    node_feats = jax.random.normal(k_node, (B, N, node_dim), jnp.float32)
    cond_feats = jax.random.normal(k_cond, (B, cond_dim), jnp.float32)
    params = make_params(k_params, node_dim, cond_dim, edge_dim)

    out = jax.block_until_ready(edge_weight_cgs_forward(node_feats, cond_feats, params))
    ref = jax.block_until_ready(edge_weight_cgs_reference(node_feats, cond_feats, params))

    assert out.shape == (B * N * N, 1), out.shape
    # bf16 MXU operands -> looser tolerance than the old all-f32 path.
    assert jnp.allclose(out, ref, atol=1e-1, rtol=5e-2), float(jnp.max(jnp.abs(out - ref)))

    print("KERNEL_OK")
</pallas_src>

<mosaic_0001>
module attributes {stable_mosaic.version = 11 : i64} {
  func.func @_edge_weight_cgs_kernel(%arg0: i32, %arg1: memref<1x16x128xbf16, #tpu.memory_space<vmem>>, %arg2: memref<1x1x128xf32, #tpu.memory_space<vmem>>, %arg3: memref<128x128xbf16, #tpu.memory_space<vmem>>, %arg4: memref<128x128xbf16, #tpu.memory_space<vmem>>, %arg5: memref<1x128xf32, #tpu.memory_space<vmem>>, %arg6: memref<1x16x128xf32, #tpu.memory_space<vmem>>, %arg7: memref<1x128x128xbf16, #tpu.memory_space<vmem>>) attributes {dimension_semantics = [#tpu.dimension_semantics<parallel>], iteration_bounds = array<i64: 2>, scalar_prefetch = 0 : i64, scratch_operands = 1 : i64, tpu.core_type = #tpu.core_type<tc>, window_params = [{transform_indices = @transform_0, window_bounds = array<i64: 1, 16, 128>}, {transform_indices = @transform_1, window_bounds = array<i64: 1, 1, 128>}, {pipeline_mode = #tpu.pipeline_mode<synchronous>, transform_indices = @transform_2, window_bounds = array<i64: 128, 128>}, {pipeline_mode = #tpu.pipeline_mode<synchronous>, transform_indices = @transform_3, window_bounds = array<i64: 128, 128>}, {pipeline_mode = #tpu.pipeline_mode<synchronous>, transform_indices = @transform_4, window_bounds = array<i64: 1, 128>}, {transform_indices = @transform_5, window_bounds = array<i64: 1, 16, 128>}]} {
    %c0 = arith.constant 0 : index
    %c0_0 = arith.constant 0 : index
    %c0_1 = arith.constant 0 : index
    %0 = vector.load %arg1[%c0, %c0_0, %c0_1] : memref<1x16x128xbf16, #tpu.memory_space<vmem>>, vector<1x16x128xbf16>
    %1 = vector.shape_cast %0 : vector<1x16x128xbf16> to vector<16x128xbf16>
    %c0_2 = arith.constant 0 : index
    %c0_3 = arith.constant 0 : index
    %2 = vector.load %arg3[%c0_2, %c0_3] : memref<128x128xbf16, #tpu.memory_space<vmem>>, vector<128x128xbf16>
    %cst = arith.constant dense<0.000000e+00> : vector<16x128xf32>
    %3 = tpu.matmul %1, %2, %cst {dimension_numbers = #tpu.dot_dimension_numbers<[1], [0], [0], [1], [0, 0, 1, 1], [], []>} : vector<16x128xbf16>, vector<128x128xbf16>, vector<16x128xf32> -> vector<16x128xf32>
    %4 = vector.shape_cast %3 : vector<16x128xf32> to vector<1x16x128xf32>
    %c0_4 = arith.constant 0 : index
    %c0_5 = arith.constant 0 : index
    %c0_6 = arith.constant 0 : index
    %5 = vector.load %arg2[%c0_4, %c0_5, %c0_6] : memref<1x1x128xf32, #tpu.memory_space<vmem>>, vector<1x1x128xf32>
    %6 = vector.broadcast %5 : vector<1x1x128xf32> to vector<1x16x128xf32>
    %7 = arith.addf %4, %6 : vector<1x16x128xf32>
    %cst_7 = arith.constant 0.000000e+00 : f32
    %8 = vector.broadcast %cst_7 : f32 to vector<1x16x128xf32>
    %9 = arith.maximumf %7, %8 : vector<1x16x128xf32>
    %10 = arith.truncf %9 : vector<1x16x128xf32> to vector<1x16x128xbf16>
    %11 = vector.shape_cast %10 : vector<1x16x128xbf16> to vector<16x128xbf16>
    %c0_8 = arith.constant 0 : index
    %c0_9 = arith.constant 0 : index
    %12 = vector.load %arg4[%c0_8, %c0_9] : memref<128x128xbf16, #tpu.memory_space<vmem>>, vector<128x128xbf16>
    %cst_10 = arith.constant dense<0.000000e+00> : vector<16x128xf32>
    %13 = tpu.matmul %11, %12, %cst_10 {dimension_numbers = #tpu.dot_dimension_numbers<[1], [0], [0], [1], [0, 0, 1, 1], [], []>} : vector<16x128xbf16>, vector<128x128xbf16>, vector<16x128xf32> -> vector<16x128xf32>
    %14 = vector.shape_cast %13 : vector<16x128xf32> to vector<1x16x128xf32>
    %c0_11 = arith.constant 0 : index
    %c0_12 = arith.constant 0 : index
    %15 = vector.load %arg5[%c0_11, %c0_12] : memref<1x128xf32, #tpu.memory_space<vmem>>, vector<1x128xf32>
    %16 = vector.shape_cast %15 : vector<1x128xf32> to vector<1x1x128xf32>
    %17 = vector.broadcast %16 : vector<1x1x128xf32> to vector<1x16x128xf32>
    %18 = arith.addf %14, %17 : vector<1x16x128xf32>
    %cst_13 = arith.constant 0.000000e+00 : f32
    %19 = vector.broadcast %cst_13 : f32 to vector<1x16x128xf32>
    %20 = arith.maximumf %18, %19 : vector<1x16x128xf32>
    %21 = arith.truncf %20 : vector<1x16x128xf32> to vector<1x16x128xbf16>
    %cst_14 = arith.constant 0.000000e+00 : bf16
    %22 = vector.broadcast %cst_14 : bf16 to vector<1x112x128xbf16>
    %c0_15 = arith.constant 0 : index
    %c16 = arith.constant 16 : index
    %c0_16 = arith.constant 0 : index
    %23 = vector.load %arg7[%c0_15, %c16, %c0_16] : memref<1x128x128xbf16, #tpu.memory_space<vmem>>, vector<1x112x128xbf16>
    tpu.vector_store %arg7[%c0_15, %c16, %c0_16], %22 {strides = array<i32>} : memref<1x128x128xbf16, #tpu.memory_space<vmem>>, vector<1x112x128xbf16>,
    %c0_17 = arith.constant 0 : index
    %c0_18 = arith.constant 0 : index
    %c0_19 = arith.constant 0 : index
    %24 = vector.load %arg7[%c0_17, %c0_18, %c0_19] : memref<1x128x128xbf16, #tpu.memory_space<vmem>>, vector<1x16x128xbf16>
    tpu.vector_store %arg7[%c0_17, %c0_18, %c0_19], %21 {strides = array<i32>} : memref<1x128x128xbf16, #tpu.memory_space<vmem>>, vector<1x16x128xbf16>,
    %c0_20 = arith.constant 0 : index
    %c0_21 = arith.constant 0 : index
    %c0_22 = arith.constant 0 : index
    %25 = vector.load %arg7[%c0_20, %c0_21, %c0_22] : memref<1x128x128xbf16, #tpu.memory_space<vmem>>, vector<1x128x128xbf16>
    %cst_23 = arith.constant dense<0.000000e+00> : vector<1x16x128xf32>
    %26 = tpu.matmul %21, %25, %cst_23 {dimension_numbers = #tpu.dot_dimension_numbers<[2], [2], [1], [1], [0, 0, 0, 1, 1, 1], [0], [0]>} : vector<1x16x128xbf16>, vector<1x128x128xbf16>, vector<1x16x128xf32> -> vector<1x16x128xf32>
    %c0_24 = arith.constant 0 : index
    %c0_25 = arith.constant 0 : index
    %c0_26 = arith.constant 0 : index
    %27 = vector.load %arg6[%c0_24, %c0_25, %c0_26] : memref<1x16x128xf32, #tpu.memory_space<vmem>>, vector<1x16x128xf32>
    tpu.vector_store %arg6[%c0_24, %c0_25, %c0_26], %26 {strides = array<i32>} : memref<1x16x128xf32, #tpu.memory_space<vmem>>, vector<1x16x128xf32>,
    return
  }
  func.func @transform_0(%arg0: i32) -> (i32, i32, i32) {
    %c0_i32 = arith.constant 0 : i32
    %c0_i32_0 = arith.constant 0 : i32
    %c0_i32_1 = arith.constant 0 : i32
    return %arg0, %c0_i32, %c0_i32_0 : i32, i32, i32
  }
  func.func @transform_1(%arg0: i32) -> (i32, i32, i32) {
    %c0_i32 = arith.constant 0 : i32
    %c0_i32_0 = arith.constant 0 : i32
    %c0_i32_1 = arith.constant 0 : i32
    return %arg0, %c0_i32, %c0_i32_0 : i32, i32, i32
  }
  func.func @transform_2(%arg0: i32) -> (i32, i32) {
    %c0_i32 = arith.constant 0 : i32
    %c0_i32_0 = arith.constant 0 : i32
    %c0_i32_1 = arith.constant 0 : i32
    return %c0_i32, %c0_i32_0 : i32, i32
  }
  func.func @transform_3(%arg0: i32) -> (i32, i32) {
    %c0_i32 = arith.constant 0 : i32
    %c0_i32_0 = arith.constant 0 : i32
    %c0_i32_1 = arith.constant 0 : i32
    return %c0_i32, %c0_i32_0 : i32, i32
  }
  func.func @transform_4(%arg0: i32) -> (i32, i32) {
    %c0_i32 = arith.constant 0 : i32
    %c0_i32_0 = arith.constant 0 : i32
    %c0_i32_1 = arith.constant 0 : i32
    return %c0_i32, %c0_i32_0 : i32, i32
  }
  func.func @transform_5(%arg0: i32) -> (i32, i32, i32) {
    %c0_i32 = arith.constant 0 : i32
    %c0_i32_0 = arith.constant 0 : i32
    %c0_i32_1 = arith.constant 0 : i32
    return %arg0, %c0_i32, %c0_i32_0 : i32, i32, i32
  }
}

</mosaic_0001>

<bundles_post_ra>
// kernel: tpu_custom_call.1
= control target key start
LH: loop header
LB: loop body
LE: loop exit
PB: predicated region body
PF: predicated region fallthrough
CT: control target
= control target key end

     0   :  { %s1549_s0 = inlined_call_operand.hbm [shape: bf16[2,16,128], index: 0, kind: input, shape index: {}]   ;;  %s1550_s1 = inlined_call_operand.hbm [shape: f32[2,1,128], index: 1, kind: input, shape index: {}]   ;;  %s1551_s2 = inlined_call_operand.hbm [shape: bf16[128,128], index: 2, kind: input, shape index: {}]   ;;  %s1552_s3 = inlined_call_operand.hbm [shape: bf16[128,128], index: 3, kind: input, shape index: {}]   ;;  %s1553_s4 = inlined_call_operand.hbm [shape: f32[1,128], index: 4, kind: input, shape index: {}]   ;;  %s1554_s5 = inlined_call_operand.hbm [shape: f32[2,16,128], index: 5, kind: output, shape index: {}]  }
   0x1   :  { %1559 = sst [smem:[#allocation18_spill]] %s1549_s0 }
   0x2   :  { %1560 = sst [smem:[#allocation19_spill]] %s1551_s2 }
   0x3   :  { %10 = vsyncpa [#allocation4], 0 }
   0x4   :  { %12 = vsyncpa [#allocation4 + $0x1], 0 }
   0x5   :  { %13 = vsyncpa [#allocation7], 0 }
   0x6   :  { %15 = vsyncpa [#allocation7 + $0x1], 0 }
   0x7   :  { %16 = vsyncpa [#allocation10], 0 }
   0x8   :  { %17 = vsyncpa [#allocation5], 0 }
   0x9   :  { %19 = vsyncpa [#allocation5 + $0x1], 0  ;;  %s1234_s18 = smov 0   ;;  %s1236_s19 = smov 0  }
   0xa   :  { %s1238_s20 = smov 0   ;;  %s1240_s21 = smov 0  }
   0xb LB: > { %s1255_s22 = sadd.s32 4294967295, %s1190_s21   ;;  %s755_s23 = sadd.s32 4294967294, %s1190_s21   ;;  %s1190_s21 = sphi %s1240_s21, %s1584_s21   ;;  %s1186_s20 = sphi %s1238_s20, %s1583_s20   ;;  %s1182_s19 = sphi %s1236_s19, %s1582_s19   ;;  %s1178_s18 = sphi %s1234_s18, %s1581_s18  }
   0xc   : > { %p45_p0 = scmp.ne.s32.totalorder %s1182_s19, %s1178_s18  ;;  %p1555_p1 = scmp.eq.s32.totalorder %s1255_s22, 0 }
   0xd   : > { %p164_p3 = scmp.eq.s32.totalorder %s755_s23, 1  ;;  %p756_p5 = scmp.ge.s32.totalorder %s1190_s21, 1 }
   0xe   : > { %p1264_p4 = por %p1555_p1, %p45_p0  ;;  %p171_p7 = scmp.lt.s32.totalorder %s1190_s21, 3 }
   0xf   : > { %p1269_p6 = por %p164_p3, %p45_p0  ;;  %s1192_s27 = smov [#allocation8]  }
  0x10   : > { %s1561_s24 = scalar_select %p1264_p4, 1, 0 }
  0x11   : > { %s1562_s25 = scalar_select %p1269_p6, 1, 0 }
  0x12   : > { %p1274_p8 = pnand %p756_p5, %p171_p7  ;;  %s183_s28 = sshll.u32 %s1192_s27, 4  ;;  %s1278_s28 = int_to_ptr.vmem [resolvable:$true] %s183_s28 }
  0x13   : > { %s1193_s30 = smov [#allocation9]   ;;  %s1194_s7 = smov [#allocation11]  }
  0x14   : > { %s1563_s26 = scalar_select %p1274_p8, 1, 0 }
  0x15   : > { %p881_p9 = pneg %p1274_p8  ;;  %s196_s6 = sshll.u32 %s1193_s30, 4  ;;  %s1289_s6 = int_to_ptr.vmem [resolvable:$true] %s196_s6 }
  0x16   : > { %s1291_s8 = sshll.u32 %s1194_s7, 4  ;;  %s1565_s2 = sld [smem:[#allocation19_spill]]  ;;  %s211_s8 = int_to_ptr.vmem [resolvable:$true] %s1291_s8 }
  0x17   : > { %p1285_p11 = pnand %p881_p9, %p1555_p1 }
  0x19   : > { %p1301_p13 = pneg %p1285_p11 }
  0x1c   : > { %s968_s11 = scalar_lea.hbm %s1565_s2, 1024 }
  0x1d   : > { %p969_p12 = scmp.ne.s32.totalorder %s1565_s2, %s968_s11  ;;  %p975_p5 = scmp.lt.u32.totalorder %s968_s11, %s1565_s2 }
  0x1f   : > { %p971_p0 = pnand %p1301_p13, %p969_p12 }
  0x21   : > { %p972_p3 = pneg %p971_p0 }
  0x23   : > { %p977_p7 = pnand %p975_p5, %p972_p3 }
  0x25   : > { %980 = shalt.err (!%p977_p7)
}
  0x26   : > { %s981_s17 = scalar_lea.vmem %s1278_s28, 1024  ;;  %p989_p2 = scmp.lt.s32.totalorder %s1278_s28, %s1278_s28 }
  0x27   : > { %p982_p9 = scmp.ne.s32.totalorder %s1278_s28, %s981_s17  ;;  %p990_p6 = scmp.lt.s32.totalorder %s981_s17, %s981_s17 }
  0x29   : > { %p984_p10 = pnand %p982_p9, %p1301_p13  ;;  %p991_p12 = por %p990_p6, %p989_p2 }
  0x2b   : > { %p985_p1 = pneg %p984_p10 }
  0x2d   : > { %p992_p0 = pnand %p991_p12, %p985_p1 }
  0x2f   : > { %995 = shalt.err (!%p992_p0)
}
  0x30   : > { %s1195_s23 = smov 64   ;;  %s1196_s27 = smov 4  }
  0x31   : > { %884 = dma.hbm_to_vmem [thread:$0]  (!%p1285_p11), %s1565_s2, 1024, %s1278_s28, [#allocation7], %s1195_s23, %s1195_s23, %s1196_s27  }
  0x32   : > { %s996_s11 = scalar_lea.hbm %s1552_s3, 1024 }
  0x33   : > { %p997_p1 = scmp.ne.s32.totalorder %s1552_s3, %s996_s11  ;;  %p1003_p10 = scmp.lt.u32.totalorder %s996_s11, %s1552_s3 }
  0x35   : > { %p999_p2 = pnand %p997_p1, %p1301_p13 }
  0x37   : > { %p1000_p6 = pneg %p999_p2 }
  0x39   : > { %p1005_p3 = pnand %p1003_p10, %p1000_p6 }
  0x3b   : > { %1008 = shalt.err (!%p1005_p3)
}
  0x3c   : > { %s1009_s28 = scalar_lea.vmem %s1289_s6, 1024  ;;  %p1017_p12 = scmp.lt.s32.totalorder %s1289_s6, %s1289_s6 }
  0x3d   : > { %p1010_p5 = scmp.ne.s32.totalorder %s1289_s6, %s1009_s28  ;;  %p1018_p0 = scmp.lt.s32.totalorder %s1009_s28, %s1009_s28 }
  0x3f   : > { %p1012_p7 = pnand %p1010_p5, %p1301_p13  ;;  %p1019_p1 = por %p1018_p0, %p1017_p12 }
  0x41   : > { %p1013_p9 = pneg %p1012_p7 }
  0x43   : > { %p1020_p2 = pnand %p1019_p1, %p1013_p9 }
  0x45   : > { %1023 = shalt.err (!%p1020_p2)
}
  0x46   : > { %887 = dma.hbm_to_vmem [thread:$0]  (!%p1285_p11), %s1552_s3, 1024, %s1289_s6, [#allocation10], %s1195_s23, %s1195_s23, %s1196_s27  }
  0x47   : > { %s1024_s10 = scalar_lea.hbm %s1553_s4, 16 }
  0x48   : > { %p1025_p6 = scmp.ne.s32.totalorder %s1553_s4, %s1024_s10  ;;  %p1031_p5 = scmp.lt.u32.totalorder %s1024_s10, %s1553_s4 }
  0x4a   : > { %p1027_p10 = pnand %p1025_p6, %p1301_p13 }
  0x4c   : > { %p1028_p3 = pneg %p1027_p10 }
  0x4e   : > { %p1033_p7 = pnand %p1031_p5, %p1028_p3 }
  0x50   : > { %1036 = shalt.err (!%p1033_p7)
}
  0x51   : > { %s1037_s16 = scalar_lea.vmem %s211_s8, 16  ;;  %s1044_s6 = scalar_lea.vmem %s211_s8, 32 }
  0x52   : > { %p1038_p9 = scmp.ne.s32.totalorder %s211_s8, %s1037_s16  ;;  %p1045_p1 = scmp.lt.s32.totalorder %s211_s8, %s211_s8 }
  0x53   : > { %p1046_p2 = scmp.lt.s32.totalorder %s1044_s6, %s1037_s16 }
  0x54   : > { %p1040_p12 = pnand %p1038_p9, %p1301_p13 }
  0x55   : > { %p1047_p4 = por %p1046_p2, %p1045_p1 }
  0x56   : > { %p1041_p0 = pneg %p1040_p12 }
  0x58   : > { %p1048_p8 = pnand %p1047_p4, %p1041_p0 }
  0x5a   : > { %1051 = shalt.err (!%p1048_p8)
}
  0x5b   : > { %890 = dma.hbm_to_vmem [thread:$0]  (!%p1285_p11), %s1553_s4, 16, %s211_s8, [#allocation10]  }
  0x5c   : > { %s1371_s14 = sadd.s32 1, %s1190_s21   ;;  %s32_s29 = sadd.s32 1, %s1186_s20 }
  0x5d   : > { %s29_s30 = ssub.s32 %s1190_s21, %s1371_s14  ;;  %p39_p8 = scmp.ne.s32.totalorder %s1186_s20, %s1182_s19 }
  0x5e   : > { %p30_p4 = scmp.eq.s32.totalorder %s29_s30, 0  ;;  %p40_p13 = scmp.eq.s32.totalorder %s1190_s21, 0 }
  0x5f   : > { %p905_p6 = scmp.lt.s32.totalorder %s1190_s21, 2  ;;  %p1567_p3 = scmp.eq.s32.totalorder %s1255_s22, 1 }
  0x60   : > { %s1381_s7 = scalar_select %p30_p4, %s1186_s20, %s32_s29  }
  0x61   : > { %p41_p10 = por %p40_p13, %p39_p8  ;;  %p1385_p5 = por %p1567_p3, %p39_p8 }
  0x62   : > { %s1390_s10 = sand.u32 1, %s1186_s20   ;;  %s795_s8 = sshll.u32 %s1190_s21, 7 }
  0x63   : > { %s1568_s9 = scalar_select %p1385_p5, 1, 0 }
  0x64   : > { %s761_s11 = sshll.u32 %s1390_s10, 3  ;;  %s1569_s0 = sld [smem:[#allocation18_spill]] }
  0x65   : > { %s225_s16 = scalar_lea.vmem [#allocation3], %s761_s11  ;;  %p1399_p11 = pnand %p905_p6, %p41_p10 }
  0x66   : > { %s232_s6 = sshll.u32 %s225_s16, 4  ;;  %s222_s30 = scalar_lea.sflag [#allocation4], %s1390_s10  ;;  %s1403_s6 = int_to_ptr.vmem [resolvable:$true] %s232_s6 }
  0x67   : > { %p1054_p9 = pneg %p1399_p11 }
  0x6a   : > { %s1397_s15 = scalar_lea.hbm %s1569_s0, %s795_s8  ;;  %s1057_s12 = scalar_lea.hbm %s1569_s0, 256 }
  0x6b   : > { %s1052_s29 = scalar_lea.hbm %s1397_s15, 128  ;;  %p1058_p1 = scmp.lt.u32.totalorder %s1397_s15, %s1569_s0 }
  0x6c   : > { %p1053_p7 = scmp.ne.s32.totalorder %s1397_s15, %s1052_s29  ;;  %p1059_p2 = scmp.lt.u32.totalorder %s1057_s12, %s1052_s29 }
  0x6d   : > { %p1061_p8 = scmp.lt.u32.totalorder %s1052_s29, %s1397_s15 }
  0x6e   : > { %p1055_p12 = pnand %p1054_p9, %p1053_p7  ;;  %p1060_p4 = por %p1059_p2, %p1058_p1 }
  0x70   : > { %p1056_p0 = pneg %p1055_p12  ;;  %p1062_p13 = por %p1061_p8, %p1060_p4 }
  0x72   : > { %p1063_p6 = pnand %p1062_p13, %p1056_p0 }
  0x74   : > { %1066 = shalt.err (!%p1063_p6)
}
  0x75   : > { %s1067_s17 = scalar_lea.vmem %s1403_s6, 128  ;;  %s1197_s8 = smov [#allocation3]  }
  0x76   : > { %p1068_p10 = scmp.ne.s32.totalorder %s1403_s6, %s1067_s17  ;;  %s1072_s11 = sshll.u32 %s1197_s8, 4  ;;  %s1073_s11 = int_to_ptr.vmem [resolvable:$false] %s1072_s11 }
  0x77   : > { %s1074_s13 = scalar_lea.vmem %s1073_s11, 256  ;;  %p1075_p12 = scmp.lt.s32.totalorder %s1403_s6, %s1073_s11 }
  0x78   : > { %p1070_p3 = pnand %p1068_p10, %p1054_p9  ;;  %p1076_p1 = scmp.lt.s32.totalorder %s1074_s13, %s1067_s17 }
  0x7a   : > { %p1071_p7 = pneg %p1070_p3  ;;  %p1077_p2 = por %p1076_p1, %p1075_p12 }
  0x7c   : > { %p1078_p4 = pnand %p1077_p2, %p1071_p7 }
  0x7e   : > { %1081 = shalt.err (!%p1078_p4)
}
  0x7f   : > { %894 = dma.hbm_to_vmem [thread:$0]  (!%p1399_p11), %s1397_s15, 128, %s1403_s6, %s222_s30, %s1195_s23, %s1195_s23, %s1196_s27  }
  0x80   : > { %s764_s29 = sshll.u32 %s1190_s21, 4  ;;  %s245_s8 = scalar_lea.vmem [#allocation6], %s1390_s10 }
  0x81   : > { %s1441_s16 = scalar_lea.hbm %s1550_s1, %s764_s29  ;;  %s252_s11 = sshll.u32 %s245_s8, 4  ;;  %s253_s11 = int_to_ptr.vmem [resolvable:$true] %s252_s11 }
  0x82   : > { %s1571_s13 = sand.u32 1, %s1190_s21   ;;  %s1082_s2 = scalar_lea.hbm %s1441_s16, 16 }
  0x83   : > { %s243_s0 = scalar_lea.sflag [#allocation7], %s1571_s13  ;;  %p1083_p0 = scmp.ne.s32.totalorder %s1441_s16, %s1082_s2 }
  0x84   : > { %s1087_s15 = scalar_lea.hbm %s1550_s1, 32  ;;  %p1088_p6 = scmp.lt.u32.totalorder %s1441_s16, %s1550_s1 }
  0x85   : > { %p1085_p8 = pnand %p1083_p0, %p1054_p9  ;;  %p1089_p10 = scmp.lt.u32.totalorder %s1087_s15, %s1082_s2 }
  0x86   : > { %p1091_p7 = scmp.lt.u32.totalorder %s1082_s2, %s1441_s16 }
  0x87   : > { %p1086_p13 = pneg %p1085_p8  ;;  %p1090_p3 = por %p1089_p10, %p1088_p6 }
  0x89   : > { %p1092_p12 = por %p1091_p7, %p1090_p3 }
  0x8b   : > { %p1093_p1 = pnand %p1092_p12, %p1086_p13 }
  0x8d   : > { %1096 = shalt.err (!%p1093_p1)
}
  0x8e   : > { %s1097_s10 = scalar_lea.vmem %s253_s11, 16  ;;  %s1198_s29 = smov [#allocation6]  }
  0x8f   : > { %p1098_p2 = scmp.ne.s32.totalorder %s253_s11, %s1097_s10  ;;  %s1102_s12 = sshll.u32 %s1198_s29, 4  ;;  %s1103_s12 = int_to_ptr.vmem [resolvable:$false] %s1102_s12 }
  0x90   : > { %s1104_s17 = scalar_lea.vmem %s1103_s12, 32  ;;  %p1105_p8 = scmp.lt.s32.totalorder %s253_s11, %s1103_s12 }
  0x91   : > { %p1100_p4 = pnand %p1098_p2, %p1054_p9  ;;  %p1106_p5 = scmp.lt.s32.totalorder %s1104_s17, %s1097_s10 }
  0x93   : > { %p1101_p0 = pneg %p1100_p4  ;;  %p1107_p6 = por %p1106_p5, %p1105_p8 }
  0x95   : > { %p1108_p10 = pnand %p1107_p6, %p1101_p0 }
  0x97   : > { %1111 = shalt.err (!%p1108_p10)
}
  0x98   : > { %897 = dma.hbm_to_vmem [thread:$0]  (!%p1399_p11), %s1441_s16, 16, %s253_s11, %s243_s0  }
  0x99   : > { %p1572_p13 = scmp.ne.s32.totalorder %s1563_s26, 0 }
  0x9a   : > { %s1468_s2 = sand.u32 (!%p1572_p13), 1, %s1182_s19   ;;  %p1573_p5 = scmp.ne.s32.totalorder (!%p1572_p13), %s1561_s24, 0 }
  0x9b   : > { %261 = sbr.rel (%p1572_p13) target bundleno = 883 (0x373), region = 40  ;;  %s766_s8 = sshll.u32 (!%p1572_p13), %s1468_s2, 3 }
  0x9c   : > { %s264_s13 = scalar_lea.sflag (!%p1572_p13), [#allocation4], %s1468_s2  ;;  %s1472_s23 = scalar_lea.vmem (!%p1572_p13), [#allocation3], %s766_s8 }
  0xa2   : > { %1157 = dma.done.wait (%p1573_p5), %s264_s13, 128  }
  0xa3   : > { %1159 = vsyncadd (%p1573_p5), %s264_s13, 4294967168  ;;  %s272_s0 = sand.u32 1, %s1255_s22   ;;  %s275_s28 = scalar_lea.vmem [#allocation6], %s1468_s2 }
  0xa4   : > { %s273_s26 = scalar_lea.sflag [#allocation7], %s272_s0 }
  0xa5   : > { %1161 = dma.done.wait (%p1573_p5), %s273_s26, 16  }
  0xa6   : > { %1163 = vsyncadd (%p1573_p5), %s273_s26, 4294967280  ;;  %p1574_p11 = scmp.eq.s32.totalorder %s1255_s22, 0 }
  0xa8   : > { %1165 = dma.done.wait (%p1574_p11), [#allocation7], 1024   ;;  %p1575_p9 = pmov %p1574_p11 }
  0xaa   : > { %1167 = vsyncadd (%p1575_p9), [#allocation7], 4294966272  ;;  %p1576_p3 = pmov %p1575_p9 }
  0xac   : > { %1169 = dma.done.wait (%p1576_p3), [#allocation10], 1040   ;;  %p1577_p7 = pmov %p1576_p3 }
  0xad   : > { %v1199_v0 = vmov 0.0   ;;  %vm1200_vm0 = vmmov 0   ;;  %v951_v1 = vld [vmem:[#allocation8] sm:$0xff]   ;;  %v952_v2 = vld [vmem:[#allocation8 + $0x8] sm:$0xff]   ;;  %v953_v3 = vld [vmem:[#allocation8 + $0x10] sm:$0xff]   ;;  %s770_s24 = sshll.u32 %s1468_s2, 4 }
  0xae   : > { %1171 = vsyncadd (%p1577_p7), [#allocation10], 4294966256  ;;  %817 = vmatprep.subr.bf16.mxu0 %v1199_v0  ;;  %833 = vmatprep.mubr.msk.bf16.mxu0 %vm1200_vm0, %v1199_v0  ;;  %v960_v4 = vld [vmem:[#allocation9] sm:$0xff]   ;;  %v954_v5 = vld [vmem:[#allocation8 + $0x18] sm:$0xff]   ;;  %s317_s16 = scalar_lea.vmem [#allocation12], %s770_s24  ;;  %s796_s27 = sshll.u32 %s1255_s22, 8 }
  0xaf   : > { %837 = vmatprep.subr.bf16.mxu1 %v1199_v0  ;;  %853 = vmatprep.mubr.msk.bf16.mxu1 %vm1200_vm0, %v1199_v0  ;;  %v961_v6 = vld [vmem:[#allocation9 + $0x8] sm:$0xff]   ;;  %v955_v7 = vld [vmem:[#allocation8 + $0x20] sm:$0xff]   ;;  %v962_v8 = vld [vmem:[#allocation9 + $0x10] sm:$0xff]   ;;  %s634_s11 = sshll.u32 %s317_s16, 4  ;;  %s1505_s30 = scalar_lea.hbm %s1554_s5, %s796_s27  ;;  %s1500_s11 = int_to_ptr.vmem [resolvable:$true] %s634_s11 }
  0xb0   : > { %818 = vmatpush3.bf16.msra.mxu0 %v951_v1  ;;  %838 = vmatpush3.bf16.msra.mxu1 %v960_v4  ;;  %v956_v9 = vld [vmem:[#allocation8 + $0x28] sm:$0xff]   ;;  %v963_v10 = vld [vmem:[#allocation9 + $0x18] sm:$0xff]   ;;  %v957_v11 = vld [vmem:[#allocation8 + $0x30] sm:$0xff]   ;;  %s621_s10 = scalar_lea.sflag [#allocation5], %s1468_s2  ;;  %s1112_s29 = scalar_lea.vmem %s1500_s11, 256 }
  0xb1   : > { %819 = vmatprep.subr.bf16.mxu0 %v1199_v0  ;;  %839 = vmatprep.subr.bf16.mxu1 %v1199_v0  ;;  %v964_v12 = vld [vmem:[#allocation9 + $0x20] sm:$0xff]   ;;  %v958_v13 = vld [vmem:[#allocation8 + $0x38] sm:$0xff]   ;;  %v965_v14 = vld [vmem:[#allocation9 + $0x28] sm:$0xff]   ;;  %p1113_p12 = scmp.ne.s32.totalorder %s1500_s11, %s1112_s29  ;;  %p1578_p1 = scmp.ne.s32.totalorder %s1568_s9, 0 }
  0xb2   : > { %v959_v15 = vld [vmem:[%s1472_s23] sm:$0xff]   ;;  %v789_v28 = vld [vmem:[#allocation11] ss:$0 sm:$0xff]  ;;  %s1201_s22 = smov [#allocation12]  }
  0xb3   : > { %v966_v16 = vld [vmem:[#allocation9 + $0x30] sm:$0xff]   ;;  %v967_v17 = vld [vmem:[#allocation9 + $0x38] sm:$0xff]   ;;  %v780_v18 = vld [vmem:[%s275_s28] ss:$0 sm:$0xff]  ;;  %p1114_p2 = pnand %p1113_p12, %p1578_p1  ;;  %s1116_s12 = sshll.u32 %s1201_s22, 4  ;;  %s1117_s12 = int_to_ptr.vmem [resolvable:$false] %s1116_s12 }
  0xb4   : > { %820 = vmatpush3.bf16.msra.mxu0 %v952_v2  ;;  %840 = vmatpush3.bf16.msra.mxu1 %v961_v6  ;;  %s1118_s17 = scalar_lea.vmem %s1117_s12, 512  ;;  %p1119_p0 = scmp.lt.s32.totalorder %s1500_s11, %s1117_s12 }
  0xb5   : > { %821 = vmatprep.subr.bf16.mxu0 %v1199_v0  ;;  %841 = vmatprep.subr.bf16.mxu1 %v1199_v0  ;;  %p1115_p4 = pneg %p1114_p2  ;;  %p1120_p8 = scmp.lt.s32.totalorder %s1118_s17, %s1112_s29 }
  0xb7   : > { %p1121_p6 = por %p1120_p8, %p1119_p0 }
  0xb8   : > { %822 = vmatpush3.bf16.msra.mxu0 %v953_v3  ;;  %842 = vmatpush3.bf16.msra.mxu1 %v962_v8 }
  0xb9   : > { %823 = vmatprep.subr.bf16.mxu0 %v1199_v0  ;;  %843 = vmatprep.subr.bf16.mxu1 %v1199_v0  ;;  %p1122_p10 = pnand %p1121_p6, %p1115_p4 }
  0xbc   : > { %824 = vmatpush3.bf16.msra.mxu0 %v954_v5  ;;  %844 = vmatpush3.bf16.msra.mxu1 %v963_v10 }
  0xbd   : > { %825 = vmatprep.subr.bf16.mxu0 %v1199_v0  ;;  %845 = vmatprep.subr.bf16.mxu1 %v1199_v0 }
  0xc0   : > { %826 = vmatpush3.bf16.msra.mxu0 %v955_v7  ;;  %846 = vmatpush3.bf16.msra.mxu1 %v964_v12 }
  0xc1   : > { %827 = vmatprep.subr.bf16.mxu0 %v1199_v0  ;;  %847 = vmatprep.subr.bf16.mxu1 %v1199_v0 }
  0xc4   : > { %828 = vmatpush3.bf16.msra.mxu0 %v956_v9  ;;  %848 = vmatpush3.bf16.msra.mxu1 %v965_v14 }
  0xc5   : > { %829 = vmatprep.subr.bf16.mxu0 %v1199_v0  ;;  %849 = vmatprep.subr.bf16.mxu1 %v1199_v0 }
  0xc8   : > { %830 = vmatpush3.bf16.msra.mxu0 %v957_v11  ;;  %850 = vmatpush3.bf16.msra.mxu1 %v966_v16 }
  0xc9   : > { %831 = vmatprep.subr.bf16.mxu0 %v1199_v0  ;;  %851 = vmatprep.subr.bf16.mxu1 %v1199_v0 }
  0xcc   : > { %832 = vmatpush3.bf16.msra.mxu0 %v958_v13  ;;  %852 = vmatpush3.bf16.msra.mxu1 %v967_v17 }
  0xcd   : > { %857 = vmatprep.subr.bf16.mxu0 %v1199_v0 }
  0xcf   : > { %834 = vmatmul.mubr.bf16.vlgmr.msra.gmra.mrb[0].mxu0 %v959_v15 }
  0xd0   : > { %859 = vmatprep.mubr.msk.bf16.mxu0 %vm1200_vm0, %v1199_v0 }
 0x1a2   : > { %v425_v19 = vpop.f32.mrb[0].mxu0 }
 0x1a3   : > { %v439_v20 = vadd.f32 %v780_v18, %v425_v19  ;;  %v835_v21 = vpop.f32.mrb[1].mxu0 }
 0x1a4   : > { %v428_v22 = vpop.f32.mrb[2].mxu0 }
 0x1a5   : > { %v440_v23 = vadd.f32 %v780_v18, %v428_v22  ;;  %v836_v24 = vpop.f32.mrb[3].mxu0  ;;  %v441_v25 = vmax.f32 %v439_v20, 0.0 }
 0x1a7   : > { %v442_v26 = vmax.f32 %v440_v23, 0.0 }
 0x1a9   : > { %v443_v27 = vpack.c.bf16 %v442_v26, %v441_v25 }
 0x1ab   : > { %854 = vmatmul.mubr.bf16.vlgmr.msra.gmra.mrb[0].mxu1 %v443_v27 }
 0x27e   : > { %v542_v29 = vpop.f32.mrb[0].mxu1 }
 0x27f   : > { %v556_v30 = vadd.f32 %v789_v28, %v542_v29  ;;  %v855_v31 = vpop.f32.mrb[1].mxu1 }
 0x280   : > { %v545_v32 = vpop.f32.mrb[2].mxu1 }
 0x281   : > { %v557_v33 = vadd.f32 %v789_v28, %v545_v32  ;;  %v856_v34 = vpop.f32.mrb[3].mxu1  ;;  %v558_v35 = vmax.f32 %v556_v30, 0.0 }
 0x283   : > { %v559_v36 = vmax.f32 %v557_v33, 0.0 }
 0x285   : > { %v560_v37 = vpack.c.bf16 %v559_v36, %v558_v35 }
 0x287   : > { %858 = vmatpush3.bf16.xpose.msra.mxu0 %v560_v37 }
 0x28e   : > { %860 = vmatmul.mubr.bf16.vlgmr.msra.gmra.mrb[4].mxu0 %v560_v37 }
 0x361   : > { %v611_v38 = vpop.f32.mrb[4].mxu0 }
 0x362   : > { %618 = vst [vmem:[%s317_s16] sm:$0xff] %v611_v38  ;;  %v861_v39 = vpop.f32.mrb[5].mxu0 }
 0x363   : > { %v614_v40 = vpop.f32.mrb[6].mxu0 }
 0x364   : > { %619 = vst [vmem:[%s317_s16 + $0x8] sm:$0xff] %v614_v40  ;;  %v862_v41 = vpop.f32.mrb[7].mxu0 }
 0x365   : > { %1125 = shalt.err (!%p1122_p10)
}
 0x366   : > { %s1126_s8 = scalar_lea.hbm %s1505_s30, 256  ;;  %s1130_s0 = scalar_lea.hbm %s1554_s5, 512 }
 0x367   : > { %p1127_p13 = scmp.ne.s32.totalorder %s1505_s30, %s1126_s8  ;;  %p1131_p9 = scmp.lt.u32.totalorder %s1505_s30, %s1554_s5 }
 0x368   : > { %p1132_p3 = scmp.lt.u32.totalorder %s1130_s0, %s1126_s8  ;;  %p1134_p12 = scmp.lt.u32.totalorder %s1126_s8, %s1505_s30 }
 0x369   : > { %p1128_p5 = pnand %p1127_p13, %p1578_p1 }
 0x36a   : > { %p1133_p7 = por %p1132_p3, %p1131_p9 }
 0x36b   : > { %p1129_p11 = pneg %p1128_p5 }
 0x36c   : > { %p1135_p2 = por %p1134_p12, %p1133_p7 }
 0x36e   : > { %p1136_p4 = pnand %p1135_p2, %p1129_p11 }
 0x370   : > { %1139 = shalt.err (!%p1136_p4)
}
 0x371   : > { %s1202_s24 = smov 128   ;;  %s1203_s16 = smov 8  }
 0x372   : > { %879 = dma.vmem_to_hbm [thread:$0]  (%p1578_p1), %s1500_s11, 256, %s1505_s30, %s621_s10, %s1202_s24, %s1202_s24, %s1203_s16  }
 0x373 PF: > { %s649_s27 = sand.u32 1, %s1178_s18   ;;  %p1579_p0 = scmp.ne.s32.totalorder %s1562_s25, 0 }
 0x374   : > { %p1580_p8 = scmp.ge.s32.totalorder %s1190_s21, 2  ;;  %s650_s15 = scalar_lea.sflag [#allocation5], %s649_s27 }
 0x376   : > { %p899_p6 = pnand %p1580_p8, %p1579_p0 }
 0x378   : > { %1173 = dma.done.wait (!%p899_p6), %s650_s15, 256  }
 0x379   : > { %1175 = vsyncadd (!%p899_p6), %s650_s15, 4294967040  ;;  %p22_p10 = scmp.ge.s32.totalorder %s1371_s14, 4   ;;  %s1581_s18 = smov %s1182_s19 }
 0x37a   : > { %s1582_s19 = smov %s1186_s20  ;;  %s1583_s20 = smov %s1381_s7 }
 0x37b   : > { %s1584_s21 = smov %s1371_s14  ;;  %24 = sbr.rel (!%p22_p10) target bundleno = 11 (0xb), region = 110 }
 0x382   :  { %655 = vsyncpa [#allocation4], 1 }
 0x383   :  { %657 = vsyncpa [#allocation4 + $0x1], 1 }
 0x384   :  { %658 = vsyncpa [#allocation7], 1 }
 0x385   :  { %660 = vsyncpa [#allocation7 + $0x1], 1 }
 0x386   :  { %661 = vsyncpa [#allocation10], 1 }
 0x387   :  { %662 = vsyncpa [#allocation5], 1 }
 0x388   :  { %664 = vsyncpa [#allocation5 + $0x1], 1 }

</bundles_post_ra>
